<compile_context>
chip_gen: v7x
topology: tpu7x:2x2x1
jax: 0.10.0
libtpu: 0.0.40
codegen_flags: <defaults>
</compile_context>

<pallas_src>
import functools

import jax
import jax.numpy as jnp
from jax.experimental import pallas as pl
from jax.experimental.pallas import tpu as pltpu


# ----------------------------------------------------------------------------
# Pallas kernel
# ----------------------------------------------------------------------------
def _img2text_kernel(x_ref, w_ref, b_ref, o_ref):
    """One (batch-block, spatial-tile) block of the 1x1 conv.

    x_ref : (Nb, Cin, T)   NCHW slice, T spatial positions on the lane axis
    w_ref : (Cmid, Cin)    1x1 conv weight (squeezed), VMEM-resident
    b_ref : (Cmid, 1)      bias (broadcast over spatial lanes), VMEM-resident
    o_ref : (Nb, Cmid, T)
    """
    w = w_ref[...]
    b = b_ref[...]
    # Nb is a small static int -> unrolled; each iteration is one 2-D lane-dense
    # MXU matmul (Cmid, Cin) @ (Cin, T).
    for i in range(x_ref.shape[0]):
        y = jnp.dot(w, x_ref[i], preferred_element_type=jnp.float32)
        o_ref[i] = (y + b).astype(o_ref.dtype)


# ----------------------------------------------------------------------------
# Tiling selection
# ----------------------------------------------------------------------------
def _round_up(x, m):
    return (x + m - 1) // m * m


def _select_tiling(N, Cin, Cmid, HW, *, max_tile=16384, min_grid=2,
                   vmem_budget=12 * 1024 * 1024):
    """Pick (batch block Nb, spatial tile t).

    t is a multiple of 128 (masked tail handles HW % 128 != 0); when the whole
    image fits in one tile, several batches are blocked per step to amortize
    the fixed per-grid-step overhead, while keeping >= min_grid grid instances
    so both v7x TensorCores have work.
    """
    # Keep the double-buffered per-step working set comfortably inside the
    # scoped-VMEM default on every generation (v5e: ~16 MiB).
    bytes_per_lane = (Cin + Cmid) * 4 * 2          # x + out, double-buffered
    lane_budget = max(128, vmem_budget // bytes_per_lane)

    t = min(_round_up(HW, 128), max_tile, _round_up(lane_budget, 128))
    n_spatial = -(-HW // t)

    nb = 1
    if n_spatial == 1:
        nb = max(1, min(N, max_tile // t, lane_budget // t))
        # Preserve at least `min_grid` grid steps (v7x has 2 TensorCores).
        while nb > 1 and (-(-N // nb)) * n_spatial < min_grid:
            nb = max(1, nb // 2)
    return nb, t


# ----------------------------------------------------------------------------
# Wrapper
# ----------------------------------------------------------------------------
def img2text_forward(x_nchw, weight, bias, *, hidden_dim):
    """Pallas implementation of Img2Text.forward.

    x_nchw : (N, Cin, H, W) float32 (PyTorch NCHW layout)
    weight : (Cmid, Cin, 1, 1)  (PyTorch Conv2d weight layout)
    bias   : (Cmid,)
    returns: (N, (Cmid*H*W)//hidden_dim, hidden_dim)
    """
    N, Cin, H, W = x_nchw.shape
    Cmid = weight.shape[0]
    HW = H * W
    assert (Cmid * HW) % hidden_dim == 0, "view() requires divisibility"

    x3 = x_nchw.reshape(N, Cin, HW)                 # free reshape (contiguous)
    w2 = weight.reshape(Cmid, Cin)
    b2 = bias.reshape(Cmid, 1)

    nb, t = _select_tiling(N, Cin, Cmid, HW)
    grid = (pl.cdiv(N, nb), pl.cdiv(HW, t))

    out = pl.pallas_call(
        _img2text_kernel,
        out_shape=jax.ShapeDtypeStruct((N, Cmid, HW), jnp.float32),
        grid=grid,
        in_specs=[
            pl.BlockSpec((nb, Cin, t), lambda n, s: (n, 0, s)),
            pl.BlockSpec((Cmid, Cin), lambda n, s: (0, 0)),   # VMEM-resident
            pl.BlockSpec((Cmid, 1), lambda n, s: (0, 0)),     # VMEM-resident
        ],
        out_specs=pl.BlockSpec((nb, Cmid, t), lambda n, s: (n, 0, s)),
        compiler_params=pltpu.CompilerParams(
            dimension_semantics=("parallel", "parallel")),
        cost_estimate=pl.CostEstimate(
            flops=2 * N * Cmid * Cin * HW,
            bytes_accessed=4 * (N * Cin * HW + N * Cmid * HW + Cmid * Cin + Cmid),
            transcendentals=0),
    )(x3, w2, b2)

    # PyTorch: x.contiguous().view(N, numel//N//hidden_dim, hidden_dim) on the
    # NCHW-contiguous conv output -- identical to reshaping (N, Cmid*H*W).
    return out.reshape(N, (Cmid * HW) // hidden_dim, hidden_dim)


# ----------------------------------------------------------------------------
# Pure-JAX reference (for correctness check)
# ----------------------------------------------------------------------------
def img2text_reference(x_nchw, weight, bias, hidden_dim):
    N, Cin, H, W = x_nchw.shape
    Cmid = weight.shape[0]
    w2 = weight.reshape(Cmid, Cin)
    y = jnp.einsum("nchw,oc->nohw", x_nchw, w2) + bias[None, :, None, None]
    return y.reshape(N, (Cmid * H * W) // hidden_dim, hidden_dim)


# ----------------------------------------------------------------------------
if __name__ == "__main__":
    # Img2Text(in_channel=4, mid_channel=8, hidden_dim=32) on a small input.
    N, Cin, H, W = 2, 4, 16, 16
    Cmid, hidden_dim = 8, 32

    key = jax.random.PRNGKey(0)
    kx, kw, kb = jax.random.split(key, 3)
    x = jax.random.normal(kx, (N, Cin, H, W), jnp.float32)          # NCHW
    weight = 0.1 * jax.random.normal(kw, (Cmid, Cin, 1, 1), jnp.float32)
    bias = 0.1 * jax.random.normal(kb, (Cmid,), jnp.float32)

    fwd = jax.jit(functools.partial(img2text_forward, hidden_dim=hidden_dim))
    out = fwd(x, weight, bias)
    out = jax.block_until_ready(out)

    expected_shape = (N, (Cmid * H * W) // hidden_dim, hidden_dim)
    assert out.shape == expected_shape, out.shape

    ref = img2text_reference(x, weight, bias, hidden_dim)
    assert jnp.allclose(out, ref, atol=1e-5, rtol=1e-5), float(
        jnp.max(jnp.abs(out - ref)))

    print("KERNEL_OK")
</pallas_src>

<mosaic_0001>
module attributes {stable_mosaic.version = 11 : i64} {
  func.func @_img2text_kernel(%arg0: i32, %arg1: i32, %arg2: memref<1x4x256xf32, #tpu.memory_space<vmem>>, %arg3: memref<8x4xf32, #tpu.memory_space<vmem>>, %arg4: memref<8x1xf32, #tpu.memory_space<vmem>>, %arg5: memref<1x8x256xf32, #tpu.memory_space<vmem>>) attributes {dimension_semantics = [#tpu.dimension_semantics<parallel>, #tpu.dimension_semantics<parallel>], iteration_bounds = array<i64: 2, 1>, scalar_prefetch = 0 : i64, scratch_operands = 0 : i64, tpu.core_type = #tpu.core_type<tc>, window_params = [{transform_indices = @transform_0, window_bounds = array<i64: 1, 4, 256>}, {pipeline_mode = #tpu.pipeline_mode<synchronous>, transform_indices = @transform_1, window_bounds = array<i64: 8, 4>}, {pipeline_mode = #tpu.pipeline_mode<synchronous>, transform_indices = @transform_2, window_bounds = array<i64: 8, 1>}, {transform_indices = @transform_3, window_bounds = array<i64: 1, 8, 256>}]} {
    %c0 = arith.constant 0 : index
    %c0_0 = arith.constant 0 : index
    %0 = vector.load %arg3[%c0, %c0_0] : memref<8x4xf32, #tpu.memory_space<vmem>>, vector<8x4xf32>
    %c0_1 = arith.constant 0 : index
    %c0_2 = arith.constant 0 : index
    %1 = vector.load %arg4[%c0_1, %c0_2] : memref<8x1xf32, #tpu.memory_space<vmem>>, vector<8x1xf32>
    %c0_3 = arith.constant 0 : index
    %c0_4 = arith.constant 0 : index
    %c0_5 = arith.constant 0 : index
    %2 = vector.load %arg2[%c0_3, %c0_4, %c0_5] : memref<1x4x256xf32, #tpu.memory_space<vmem>>, vector<1x4x256xf32>
    %3 = vector.shape_cast %2 : vector<1x4x256xf32> to vector<4x256xf32>
    %cst = arith.constant dense<0.000000e+00> : vector<8x256xf32>
    %4 = tpu.matmul %0, %3, %cst {dimension_numbers = #tpu.dot_dimension_numbers<[1], [0], [0], [1], [0, 0, 1, 1], [], []>} : vector<8x4xf32>, vector<4x256xf32>, vector<8x256xf32> -> vector<8x256xf32>
    %5 = vector.broadcast %1 : vector<8x1xf32> to vector<8x256xf32>
    %6 = arith.addf %4, %5 : vector<8x256xf32>
    %c0_6 = arith.constant 0 : index
    %c0_7 = arith.constant 0 : index
    %c0_8 = arith.constant 0 : index
    %7 = vector.load %arg5[%c0_6, %c0_7, %c0_8] : memref<1x8x256xf32, #tpu.memory_space<vmem>>, vector<1x8x256xf32>
    %8 = vector.shape_cast %7 : vector<1x8x256xf32> to vector<8x256xf32>
    %9 = vector.shape_cast %6 : vector<8x256xf32> to vector<1x8x256xf32>
    tpu.vector_store %arg5[%c0_6, %c0_7, %c0_8], %9 {strides = array<i32>} : memref<1x8x256xf32, #tpu.memory_space<vmem>>, vector<1x8x256xf32>,
    return
  }
  func.func @transform_0(%arg0: i32, %arg1: i32) -> (i32, i32, i32) {
    %c0_i32 = arith.constant 0 : i32
    %c0_i32_0 = arith.constant 0 : i32
    return %arg0, %c0_i32, %arg1 : i32, i32, i32
  }
  func.func @transform_1(%arg0: i32, %arg1: i32) -> (i32, i32) {
    %c0_i32 = arith.constant 0 : i32
    %c0_i32_0 = arith.constant 0 : i32
    %c0_i32_1 = arith.constant 0 : i32
    return %c0_i32, %c0_i32_0 : i32, i32
  }
  func.func @transform_2(%arg0: i32, %arg1: i32) -> (i32, i32) {
    %c0_i32 = arith.constant 0 : i32
    %c0_i32_0 = arith.constant 0 : i32
    %c0_i32_1 = arith.constant 0 : i32
    return %c0_i32, %c0_i32_0 : i32, i32
  }
  func.func @transform_3(%arg0: i32, %arg1: i32) -> (i32, i32, i32) {
    %c0_i32 = arith.constant 0 : i32
    %c0_i32_0 = arith.constant 0 : i32
    return %arg0, %c0_i32, %arg1 : i32, i32, i32
  }
}

</mosaic_0001>

<bundles_post_ra>
// kernel: img2text_forward.1
= control target key start
LH: loop header
LB: loop body
LE: loop exit
PB: predicated region body
PF: predicated region fallthrough
CT: control target
= control target key end

     0   :  { %s479_s12 = smov 0   ;;  %s481_s13 = smov 0   ;;  %s518_s0 = inlined_call_operand.vmem [shape: f32[2,4,256], index: 0, kind: input, shape index: {}]   ;;  %s519_s1 = inlined_call_operand.vmem [shape: f32[8,4], index: 1, kind: input, shape index: {}]   ;;  %s520_s2 = inlined_call_operand.vmem [shape: f32[8,1], index: 2, kind: input, shape index: {}]   ;;  %s521_s3 = inlined_call_operand.vmem [shape: f32[2,8,256], index: 3, kind: output, shape index: {}]  }
   0x1   :  { %s483_s14 = smov 0  }
   0x2 LB: > { %s25_s15 = sadd.s32 1, %s451_s13  ;;  %p393_p0 = scmp.ge.s32.totalorder %s455_s14, 1  ;;  %s455_s14 = sphi %s483_s14, %s13_s14   ;;  %s451_s13 = sphi %s481_s13, %s523_s13   ;;  %s447_s12 = sphi %s479_s12, %s522_s12  }
   0x3   : > { %p27_p1 = scmp.ge.s32.totalorder %s25_s15, 2  ;;  %p158_p2 = scmp.lt.s32.totalorder %s455_s14, 3 }
   0x5   : > { %s525_s15 = smov (%p27_p1, %s25_s15), 0  ;;  %p159_p3 = pnand %p393_p0, %p158_p2 }
   0x6   : > { %p191_p4 = scmp.lt.s32.totalorder (!%p159_p3), %s447_s12, 1  ;;  %v457_v0 = vmov (!%p159_p3), 0.0   ;;  %v458_v1 = vmov (!%p159_p3), 0   ;;  %v211_v2 = vld [vmem:[%s520_s2] sm:$0xff] (!%p159_p3)  ;;  %vm224_vm0 = vcmask (!%p159_p3), 1043456   ;;  %vm220_vm1 = vcmask (!%p159_p3), 31744  }
   0x7   : > { %162 = sbr.rel (%p159_p3) target bundleno = 238 (0xee), region = 32  ;;  %293 = vmatprep.mubr.f32.mxu0 (!%p159_p3), %v457_v0  ;;  %431 = vset.pattern.permute.xlu0 (!%p159_p3), %v458_v1  ;;  %v210_v5 = vld [vmem:[%s519_s1] sm:$0xff] (!%p159_p3) }
   0x8   : > { %215 = vperm.xlu0 (!%p159_p3), %431, %v211_v2  }
   0xe   : > { %s527_s12 = smov (!%p191_p4, %s447_s12), 1 }
   0xf   : > { %s403_s18 = sshll.u32 %s527_s12, 3  ;;  %s404_s24 = sshll.u32 %s527_s12, 4 }
  0x10   : > { %s198_s21 = scalar_lea.vmem %s518_s0, %s403_s18  ;;  %s208_s27 = scalar_lea.vmem %s521_s3, %s404_s24 }
  0x11   : > { %v212_v3 = vld [vmem:[%s198_s21] sm:$0xff] }
  0x12   : > { %v219_v4 = vcombine.high %v212_v3, %v212_v3 }
  0x14   : > { %398 = vmatprep.subr.msk.mxu0 %vm224_vm0, %v219_v4 }
  0x15   : > { %399 = vmatpush1.msk.msra.mxu0 %vm224_vm0, %v212_v3 }
  0x16   : > { %400 = vmatmul.mubr.msk.f32.vlgmr.msra.gmra.mrb[0].mxu0 %vm220_vm1, %v210_v5 }
  0x87   : > { %v216_v6 = vpop.permute.xlu0 %215 }
  0xe9   : > { %v295_v7 = vpop.f32.mrb[0].mxu0 }
  0xea   : > { %v296_v8 = vadd.f32 %v295_v7, %v216_v6  ;;  %v297_v9 = vpop.f32.mrb[1].mxu0 }
  0xeb   : > { %v298_v10 = vadd.f32 %v297_v9, %v216_v6 }
  0xec   : > { %300 = vst [vmem:[%s208_s27] sm:$0xff] %v296_v8 }
  0xed   : > { %301 = vst [vmem:[%s208_s27 + $0x8] sm:$0xff] %v298_v10 }
  0xee PF: > { %s13_s14 = sadd.s32 1, %s455_s14   ;;  %s522_s12 = smov %s451_s13 }
  0xef   : > { %p10_p5 = scmp.ge.s32.totalorder %s13_s14, 4   ;;  %s523_s13 = smov %s525_s15 }
  0xf1   :  { %12 = sbr.rel (!%p10_p5) target bundleno = 2 (0x2), region = 62 }

</bundles_post_ra>
